<compile_context>
chip_gen: v6e
topology: v6e:2x2x1
jax: 0.10.0
libtpu: 0.0.40
codegen_flags: <defaults>
</compile_context>

<pallas_src>
import jax
import jax.numpy as jnp
from jax.experimental import pallas as pl
from jax.experimental.pallas import tpu as pltpu

LANE = 128
SUBLANE = 8


def _round_up(n, m):
    return (n + m - 1) // m * m


def _cdiv(a, b):
    return (a + b - 1) // b


def _pad2(a, rows, cols):
    return jnp.pad(a, ((0, rows - a.shape[0]), (0, cols - a.shape[1])))


def mlp_kernel(x_ref, w1_ref, b1_ref, w2_ref, b2_ref, w3_ref, b3_ref, o_ref):
    # In-kernel cast of the activation tile (mirrors `.to(torch.float32)` then
    # bf16 at the MXU input); bf16 dot inputs, f32 accumulation.
    x = x_ref[...].astype(jnp.bfloat16)

    # Layer 1: Linear + ReLU (Dropout = identity in eval mode).
    h1 = jnp.dot(x, w1_ref[...], preferred_element_type=jnp.float32)
    h1 = jnp.maximum(h1 + b1_ref[...], 0.0)          # f32 VPU work
    # TODO(synk): training-mode Dropout(0.1) (pltpu.prng_seed/prng_random_bits
    # mask + 1/(1-p) scaling) not emitted; this forward matches eval mode.

    # Layer 2: Linear + ReLU (Dropout = identity in eval mode).
    h2 = jnp.dot(h1.astype(jnp.bfloat16), w2_ref[...],
                 preferred_element_type=jnp.float32)
    h2 = jnp.maximum(h2 + b2_ref[...], 0.0)

    # Layer 3: Linear (logits).  Compute full 128-lane MXU output, store only
    # the true n_tasks columns (narrow, lane-masked writeback).
    logits = jnp.dot(h2.astype(jnp.bfloat16), w3_ref[...],
                     preferred_element_type=jnp.float32)
    logits = logits + b3_ref[...]
    o_ref[...] = logits[:, : o_ref.shape[1]]


def prepare_params(params):
    """Pad/cast weights & biases ONCE (hoisted out of the per-call hot path).

    Padded weight rows/cols and bias entries are zero, so padded hidden/logit
    lanes carry exact zeros and never affect the true outputs.
    """
    w1, b1, w2, b2, w3, b3 = params
    n_feats, n_hiddens = w1.shape
    n_tasks = w3.shape[1]
    H_p = _round_up(n_hiddens, LANE)
    T_p = _round_up(n_tasks, LANE)
    return dict(
        w1=_pad2(w1, n_feats, H_p).astype(jnp.bfloat16),   # K stays unpadded
        b1=_pad2(b1, 1, H_p).astype(jnp.float32),
        w2=_pad2(w2, H_p, H_p).astype(jnp.bfloat16),
        b2=_pad2(b2, 1, H_p).astype(jnp.float32),
        w3=_pad2(w3, H_p, T_p).astype(jnp.bfloat16),
        b3=_pad2(b3, 1, T_p).astype(jnp.float32),
        n_feats=n_feats,
        n_hiddens=n_hiddens,
        n_tasks=n_tasks,
    )


def mlp_forward(x, prep, *, block_b=1024):
    """x: [B, n_feats] (any float/int dtype; cast happens inside the kernel)."""
    w1p, b1p = prep["w1"], prep["b1"]
    w2p, b2p = prep["w2"], prep["b2"]
    w3p, b3p = prep["w3"], prep["b3"]
    n_feats, n_hiddens, n_tasks = prep["n_feats"], prep["n_hiddens"], prep["n_tasks"]

    B = x.shape[0]
    assert x.shape[1] == n_feats

    # Target exactly 2 grid steps (feeds both TensorCores on v7x via the
    # "parallel" batch axis); on 1-TC v5e/v6e the extra step costs ~0.35 us.
    # Tiles stay large (>= B/2 rows) — per-step overhead, not VMEM, is the
    # binding resource here on every generation.
    TB = min(block_b, max(SUBLANE, _round_up(_cdiv(B, 2), SUBLANE)))
    steps = _cdiv(B, TB)
    B_p = steps * TB
    xp = x if B_p == B else jnp.pad(x, ((0, B_p - B), (0, 0)))

    # Weight/bias blocks: constant index_map -> VMEM-resident, not re-DMA'd
    # per grid step.  x/out blocks index the batch axis (double-buffered).
    const = lambda a: pl.BlockSpec(a.shape, lambda i: (0, 0))

    # Honest (unpadded) cost hint for XLA's scheduler.
    flops = 2 * B * (n_feats * n_hiddens + n_hiddens * n_hiddens
                     + n_hiddens * n_tasks)
    bytes_accessed = (
        xp.size * xp.dtype.itemsize
        + sum(a.size * a.dtype.itemsize
              for a in (w1p, b1p, w2p, b2p, w3p, b3p))
        + B_p * n_tasks * 4
    )

    out = pl.pallas_call(
        mlp_kernel,
        out_shape=jax.ShapeDtypeStruct((B_p, n_tasks), jnp.float32),
        grid=(steps,),
        in_specs=[
            # last dim == full array dim (n_feats) -> legal, no lane padding.
            pl.BlockSpec((TB, n_feats), lambda i: (i, 0)),
            const(w1p), const(b1p),
            const(w2p), const(b2p),
            const(w3p), const(b3p),
        ],
        # Narrow output block (last dim == full array dim n_tasks): lane-masked
        # stores, ~12.8x fewer HBM write bytes than a padded 128-lane f32 slab.
        out_specs=pl.BlockSpec((TB, n_tasks), lambda i: (i, 0)),
        compiler_params=pltpu.CompilerParams(
            # Batch axis is embarrassingly parallel: sharded across both
            # TensorCores on v7x, harmless on v5e/v6e.
            dimension_semantics=("parallel",),
        ),
        cost_estimate=pl.CostEstimate(
            flops=flops, transcendentals=0, bytes_accessed=bytes_accessed),
    )(xp, w1p, b1p, w2p, b2p, w3p, b3p)

    # Only batch padding (if any) needs slicing off; lanes are already exact.
    return out if B_p == B else out[:B]


def init_params(key, n_feats, n_hiddens, n_tasks):
    """Deterministic init mimicking nn.Linear's uniform(-1/sqrt(fan_in), 1/sqrt(fan_in))."""
    ks = jax.random.split(key, 6)

    def linear(kw, kb, fan_in, fan_out):
        bound = 1.0 / jnp.sqrt(jnp.float32(fan_in))
        w = jax.random.uniform(kw, (fan_in, fan_out), jnp.float32, -bound, bound)
        b = jax.random.uniform(kb, (1, fan_out), jnp.float32, -bound, bound)
        return w, b

    w1, b1 = linear(ks[0], ks[1], n_feats, n_hiddens)
    w2, b2 = linear(ks[2], ks[3], n_hiddens, n_hiddens)
    w3, b3 = linear(ks[4], ks[5], n_hiddens, n_tasks)
    return (w1, b1, w2, b2, w3, b3)


def _ref_forward(x, params):
    """Plain-JAX reference with the same bf16-input / f32-accumulate math."""
    w1, b1, w2, b2, w3, b3 = params
    xf = x.astype(jnp.float32)
    h = jnp.dot(xf.astype(jnp.bfloat16), w1.astype(jnp.bfloat16),
                preferred_element_type=jnp.float32) + b1
    h = jnp.maximum(h, 0.0)
    h = jnp.dot(h.astype(jnp.bfloat16), w2.astype(jnp.bfloat16),
                preferred_element_type=jnp.float32) + b2
    h = jnp.maximum(h, 0.0)
    return jnp.dot(h.astype(jnp.bfloat16), w3.astype(jnp.bfloat16),
                   preferred_element_type=jnp.float32) + b3


if __name__ == "__main__":
    key = jax.random.PRNGKey(0)
    k_x, k_p = jax.random.split(key)

    # Small shapes consistent with the module; B chosen to exercise the
    # 2-step batch grid (two 256-row tiles) while staying tiny.
    B, n_feats, n_hiddens, n_tasks = 512, 32, 64, 10
    x = jax.random.normal(k_x, (B, n_feats), jnp.float32)
    params = init_params(k_p, n_feats, n_hiddens, n_tasks)

    prepared = prepare_params(params)   # pad/cast once, outside the hot path
    out = mlp_forward(x, prepared)
    jax.block_until_ready(out)

    ref = _ref_forward(x, params)
    assert out.shape == (B, n_tasks)
    assert jnp.allclose(out, ref, atol=2e-2, rtol=2e-2), (
        float(jnp.max(jnp.abs(out - ref))))

    print("KERNEL_OK")
</pallas_src>

<mosaic_0001>
module attributes {stable_mosaic.version = 11 : i64} {
  func.func @mlp_kernel(%arg0: i32, %arg1: memref<256x32xf32, #tpu.memory_space<vmem>>, %arg2: memref<32x128xbf16, #tpu.memory_space<vmem>>, %arg3: memref<1x128xf32, #tpu.memory_space<vmem>>, %arg4: memref<128x128xbf16, #tpu.memory_space<vmem>>, %arg5: memref<1x128xf32, #tpu.memory_space<vmem>>, %arg6: memref<128x128xbf16, #tpu.memory_space<vmem>>, %arg7: memref<1x128xf32, #tpu.memory_space<vmem>>, %arg8: memref<256x10xf32, #tpu.memory_space<vmem>>) attributes {dimension_semantics = [#tpu.dimension_semantics<parallel>], iteration_bounds = array<i64: 2>, scalar_prefetch = 0 : i64, scratch_operands = 0 : i64, tpu.core_type = #tpu.core_type<tc>, window_params = [{transform_indices = @transform_0, window_bounds = array<i64: 256, 32>}, {pipeline_mode = #tpu.pipeline_mode<synchronous>, transform_indices = @transform_1, window_bounds = array<i64: 32, 128>}, {pipeline_mode = #tpu.pipeline_mode<synchronous>, transform_indices = @transform_2, window_bounds = array<i64: 1, 128>}, {pipeline_mode = #tpu.pipeline_mode<synchronous>, transform_indices = @transform_3, window_bounds = array<i64: 128, 128>}, {pipeline_mode = #tpu.pipeline_mode<synchronous>, transform_indices = @transform_4, window_bounds = array<i64: 1, 128>}, {pipeline_mode = #tpu.pipeline_mode<synchronous>, transform_indices = @transform_5, window_bounds = array<i64: 128, 128>}, {pipeline_mode = #tpu.pipeline_mode<synchronous>, transform_indices = @transform_6, window_bounds = array<i64: 1, 128>}, {transform_indices = @transform_7, window_bounds = array<i64: 256, 10>}]} {
    %c0 = arith.constant 0 : index
    %c0_0 = arith.constant 0 : index
    %0 = vector.load %arg1[%c0, %c0_0] : memref<256x32xf32, #tpu.memory_space<vmem>>, vector<256x32xf32>
    %1 = arith.truncf %0 : vector<256x32xf32> to vector<256x32xbf16>
    %c0_1 = arith.constant 0 : index
    %c0_2 = arith.constant 0 : index
    %2 = vector.load %arg2[%c0_1, %c0_2] : memref<32x128xbf16, #tpu.memory_space<vmem>>, vector<32x128xbf16>
    %cst = arith.constant dense<0.000000e+00> : vector<256x128xf32>
    %3 = tpu.matmul %1, %2, %cst {dimension_numbers = #tpu.dot_dimension_numbers<[1], [0], [0], [1], [0, 0, 1, 1], [], []>} : vector<256x32xbf16>, vector<32x128xbf16>, vector<256x128xf32> -> vector<256x128xf32>
    %c0_3 = arith.constant 0 : index
    %c0_4 = arith.constant 0 : index
    %4 = vector.load %arg3[%c0_3, %c0_4] : memref<1x128xf32, #tpu.memory_space<vmem>>, vector<1x128xf32>
    %5 = vector.broadcast %4 : vector<1x128xf32> to vector<256x128xf32>
    %6 = arith.addf %3, %5 : vector<256x128xf32>
    %cst_5 = arith.constant 0.000000e+00 : f32
    %7 = vector.broadcast %cst_5 : f32 to vector<256x128xf32>
    %8 = arith.maximumf %6, %7 : vector<256x128xf32>
    %9 = arith.truncf %8 : vector<256x128xf32> to vector<256x128xbf16>
    %c0_6 = arith.constant 0 : index
    %c0_7 = arith.constant 0 : index
    %10 = vector.load %arg4[%c0_6, %c0_7] : memref<128x128xbf16, #tpu.memory_space<vmem>>, vector<128x128xbf16>
    %cst_8 = arith.constant dense<0.000000e+00> : vector<256x128xf32>
    %11 = tpu.matmul %9, %10, %cst_8 {dimension_numbers = #tpu.dot_dimension_numbers<[1], [0], [0], [1], [0, 0, 1, 1], [], []>} : vector<256x128xbf16>, vector<128x128xbf16>, vector<256x128xf32> -> vector<256x128xf32>
    %c0_9 = arith.constant 0 : index
    %c0_10 = arith.constant 0 : index
    %12 = vector.load %arg5[%c0_9, %c0_10] : memref<1x128xf32, #tpu.memory_space<vmem>>, vector<1x128xf32>
    %13 = vector.broadcast %12 : vector<1x128xf32> to vector<256x128xf32>
    %14 = arith.addf %11, %13 : vector<256x128xf32>
    %cst_11 = arith.constant 0.000000e+00 : f32
    %15 = vector.broadcast %cst_11 : f32 to vector<256x128xf32>
    %16 = arith.maximumf %14, %15 : vector<256x128xf32>
    %17 = arith.truncf %16 : vector<256x128xf32> to vector<256x128xbf16>
    %c0_12 = arith.constant 0 : index
    %c0_13 = arith.constant 0 : index
    %18 = vector.load %arg6[%c0_12, %c0_13] : memref<128x128xbf16, #tpu.memory_space<vmem>>, vector<128x128xbf16>
    %cst_14 = arith.constant dense<0.000000e+00> : vector<256x128xf32>
    %19 = tpu.matmul %17, %18, %cst_14 {dimension_numbers = #tpu.dot_dimension_numbers<[1], [0], [0], [1], [0, 0, 1, 1], [], []>} : vector<256x128xbf16>, vector<128x128xbf16>, vector<256x128xf32> -> vector<256x128xf32>
    %c0_15 = arith.constant 0 : index
    %c0_16 = arith.constant 0 : index
    %20 = vector.load %arg7[%c0_15, %c0_16] : memref<1x128xf32, #tpu.memory_space<vmem>>, vector<1x128xf32>
    %21 = vector.broadcast %20 : vector<1x128xf32> to vector<256x128xf32>
    %22 = arith.addf %19, %21 : vector<256x128xf32>
    %23 = vector.extract_strided_slice %22 {offsets = [0, 0], sizes = [256, 10], strides = [1, 1]} : vector<256x128xf32> to vector<256x10xf32>
    %c0_17 = arith.constant 0 : index
    %c0_18 = arith.constant 0 : index
    %24 = vector.load %arg8[%c0_17, %c0_18] : memref<256x10xf32, #tpu.memory_space<vmem>>, vector<256x10xf32>
    tpu.vector_store %arg8[%c0_17, %c0_18], %23 {strides = array<i32>} : memref<256x10xf32, #tpu.memory_space<vmem>>, vector<256x10xf32>,
    return
  }
  func.func @transform_0(%arg0: i32) -> (i32, i32) {
    %c0_i32 = arith.constant 0 : i32
    %c0_i32_0 = arith.constant 0 : i32
    return %arg0, %c0_i32 : i32, i32
  }
  func.func @transform_1(%arg0: i32) -> (i32, i32) {
    %c0_i32 = arith.constant 0 : i32
    %c0_i32_0 = arith.constant 0 : i32
    %c0_i32_1 = arith.constant 0 : i32
    return %c0_i32, %c0_i32_0 : i32, i32
  }
  func.func @transform_2(%arg0: i32) -> (i32, i32) {
    %c0_i32 = arith.constant 0 : i32
    %c0_i32_0 = arith.constant 0 : i32
    %c0_i32_1 = arith.constant 0 : i32
    return %c0_i32, %c0_i32_0 : i32, i32
  }
  func.func @transform_3(%arg0: i32) -> (i32, i32) {
    %c0_i32 = arith.constant 0 : i32
    %c0_i32_0 = arith.constant 0 : i32
    %c0_i32_1 = arith.constant 0 : i32
    return %c0_i32, %c0_i32_0 : i32, i32
  }
  func.func @transform_4(%arg0: i32) -> (i32, i32) {
    %c0_i32 = arith.constant 0 : i32
    %c0_i32_0 = arith.constant 0 : i32
    %c0_i32_1 = arith.constant 0 : i32
    return %c0_i32, %c0_i32_0 : i32, i32
  }
  func.func @transform_5(%arg0: i32) -> (i32, i32) {
    %c0_i32 = arith.constant 0 : i32
    %c0_i32_0 = arith.constant 0 : i32
    %c0_i32_1 = arith.constant 0 : i32
    return %c0_i32, %c0_i32_0 : i32, i32
  }
  func.func @transform_6(%arg0: i32) -> (i32, i32) {
    %c0_i32 = arith.constant 0 : i32
    %c0_i32_0 = arith.constant 0 : i32
    %c0_i32_1 = arith.constant 0 : i32
    return %c0_i32, %c0_i32_0 : i32, i32
  }
  func.func @transform_7(%arg0: i32) -> (i32, i32) {
    %c0_i32 = arith.constant 0 : i32
    %c0_i32_0 = arith.constant 0 : i32
    return %arg0, %c0_i32 : i32, i32
  }
}

</mosaic_0001>

<bundles_post_ra>
// kernel: tpu_custom_call.1
= control target key start
LH: loop header
LB: loop body
LE: loop exit
PB: predicated region body
PF: predicated region fallthrough
CT: control target
= control target key end

     0   :  { %s1537_s24 = smov 0   ;;  %s1857_s0 = inlined_call_operand.vmem [shape: f32[512,32], index: 0, kind: input, shape index: {}]   ;;  %s1858_s1 = inlined_call_operand.vmem [shape: bf16[32,128], index: 1, kind: input, shape index: {}]   ;;  %s1859_s2 = inlined_call_operand.vmem [shape: f32[1,128], index: 2, kind: input, shape index: {}]   ;;  %s1860_s3 = inlined_call_operand.vmem [shape: bf16[128,128], index: 3, kind: input, shape index: {}]   ;;  %s1861_s4 = inlined_call_operand.vmem [shape: f32[1,128], index: 4, kind: input, shape index: {}]   ;;  %s1862_s5 = inlined_call_operand.vmem [shape: bf16[128,128], index: 5, kind: input, shape index: {}]   ;;  %s1863_s6 = inlined_call_operand.vmem [shape: f32[1,128], index: 6, kind: input, shape index: {}]   ;;  %s1864_s7 = inlined_call_operand.vmem [shape: f32[512,10], index: 7, kind: output, shape index: {}]  }
   0x1 LB: > { %s1213_s25 = sadd.s32 4294967295, %s1495_s24   ;;  %p1217_p0 = scmp.ge.s32.totalorder %s1495_s24, 1  ;;  %s1495_s24 = sphi %s1537_s24, %s17_s24  }
   0x2   : > { %p238_p1 = scmp.lt.s32.totalorder %s1495_s24, 3 }
   0x4   : > { %p239_p2 = pnand %p1217_p0, %p238_p1 }
   0x5   : > { %s1218_s28 = sshll.u32 (!%p239_p2), %s1213_s25, 5 }
   0x6   : > { %242 = sbr.rel (%p239_p2) target bundleno = 690 (0x2b2), region = 48  ;;  %p271_p3 = scmp.lt.s32.totalorder (!%p239_p2), %s1218_s28, 63 }
   0xb   : > { %v1471_v0 = vld [vmem:[%s1858_s1 + $0x8] sm:$0xff]   ;;  %v1472_v1 = vld [vmem:[%s1858_s1] sm:$0xff]   ;;  %s1866_s28 = smov (!%p271_p3, %s1218_s28), 63  ;;  %v1473_v2 = vld [vmem:[%s1860_s3 + $0x38] sm:$0xff]   ;;  %vm354_vm0 = vcmask 261120   ;;  %vm1124_vm1 = vcmask 80896  }
   0xc   : > { %1327 = vmatprep.subr.bf16.mxu0 %v1471_v0  ;;  %1459 = vmatprep.subr.bf16.mxu1 %v1471_v0  ;;  %s1219_s10 = sshll.u32 %s1866_s28, 3  ;;  %v1474_v24 = vld [vmem:[%s1860_s3 + $0x30] sm:$0xff]   ;;  %v1475_v30 = vld [vmem:[%s1860_s3 + $0x28] sm:$0xff]   ;;  %v1476_v38 = vld [vmem:[%s1860_s3 + $0x20] sm:$0xff]  }
   0xd   : > { %1328 = vmatpush3.bf16.msra.mxu0 %v1471_v0  ;;  %1461 = vmatpush3.bf16.msra.mxu1 %v1471_v0  ;;  %s1562_s13 = scalar_lea.vmem %s1857_s0, %s1219_s10  ;;  %v1477_v46 = vld [vmem:[%s1860_s3 + $0x18] sm:$0xff]   ;;  %v1478_v55 = vld [vmem:[%s1860_s3 + $0x10] sm:$0xff]   ;;  %v1479_v56 = vld [vmem:[%s1860_s3 + $0x8] sm:$0xff]   ;;  %s1756_s12 = scalar_lea.vmem %s1864_s7, %s1219_s10 }
   0xe   : > { %1329 = vmatprep.subr.bf16.mxu0 %v1472_v1  ;;  %1460 = vmatprep.subr.bf16.mxu1 %v1472_v1  ;;  %v283_v3 = vld [vmem:[%s1562_s13] sm:$0xff]  ;;  %v284_v4 = vld [vmem:[%s1562_s13 + $0x8] sm:$0xff]  ;;  %v285_v5 = vld [vmem:[%s1562_s13 + $0x10] sm:$0xff] }
   0xf   : > { %v315_v6 = vpack.c.bf16 %v284_v4, %v283_v3  ;;  %v286_v7 = vld [vmem:[%s1562_s13 + $0x18] sm:$0xff]  ;;  %v287_v8 = vld [vmem:[%s1562_s13 + $0x20] sm:$0xff]  ;;  %v288_v9 = vld [vmem:[%s1562_s13 + $0x28] sm:$0xff] }
  0x10   : > { %v316_v10 = vpack.c.bf16 %v286_v7, %v285_v5  ;;  %v317_v11 = vpack.c.bf16 %v288_v9, %v287_v8  ;;  %v289_v12 = vld [vmem:[%s1562_s13 + $0x30] sm:$0xff]  ;;  %v290_v13 = vld [vmem:[%s1562_s13 + $0x38] sm:$0xff]  ;;  %v291_v14 = vld [vmem:[%s1562_s13 + $0x40] sm:$0xff] }
  0x11   : > { %1330 = vmatpush3.bf16.msra.mxu0 %v1472_v1  ;;  %1462 = vmatpush3.bf16.msra.mxu1 %v1472_v1  ;;  %v292_v15 = vld [vmem:[%s1562_s13 + $0x48] sm:$0xff]  ;;  %v299_v16 = vld [vmem:[%s1562_s13 + $0x80] sm:$0xff]  ;;  %v301_v19 = vld [vmem:[%s1562_s13 + $0x90] sm:$0xff]  ;;  %v318_v25 = vpack.c.bf16 %v290_v13, %v289_v12 }
  0x12   : > { %1363 = vmatprep.subr.bf16.mxu1 %v1473_v2  ;;  %1331 = vmatprep.mubr.msk.bf16.mxu0 %vm354_vm0, %v315_v6  ;;  %v300_v17 = vld [vmem:[%s1562_s13 + $0x88] sm:$0xff]  ;;  %v302_v20 = vld [vmem:[%s1562_s13 + $0x98] sm:$0xff]  ;;  %v303_v21 = vld [vmem:[%s1562_s13 + $0xa0] sm:$0xff]  ;;  %v319_v27 = vpack.c.bf16 %v292_v15, %v291_v14 }
  0x13   : > { %v323_v18 = vpack.c.bf16 %v300_v17, %v299_v16  ;;  %v324_v22 = vpack.c.bf16 %v302_v20, %v301_v19  ;;  %v304_v23 = vld [vmem:[%s1562_s13 + $0xa8] sm:$0xff]  ;;  %v305_v28 = vld [vmem:[%s1562_s13 + $0xb0] sm:$0xff]  ;;  %v306_v29 = vld [vmem:[%s1562_s13 + $0xb8] sm:$0xff] }
  0x14   : > { %1332 = vmatmul.mubr.msk.bf16.vlgmr.msra.gmra.mxu0 %vm354_vm0, %v316_v10  ;;  %v325_v26 = vpack.c.bf16 %v304_v23, %v303_v21  ;;  %v307_v31 = vld [vmem:[%s1562_s13 + $0xc0] sm:$0xff]  ;;  %v308_v32 = vld [vmem:[%s1562_s13 + $0xc8] sm:$0xff]  ;;  %v293_v33 = vld [vmem:[%s1562_s13 + $0x50] sm:$0xff]  ;;  %v326_v37 = vpack.c.bf16 %v306_v29, %v305_v28 }
  0x15   : > { %1335 = vmatprep.mubr.msk.bf16.mxu0 %vm354_vm0, %v317_v11  ;;  %1347 = vmatprep.mubr.msk.bf16.mxu1 %vm354_vm0, %v323_v18  ;;  %v294_v34 = vld [vmem:[%s1562_s13 + $0x58] sm:$0xff]  ;;  %v295_v35 = vld [vmem:[%s1562_s13 + $0x60] sm:$0xff]  ;;  %v296_v36 = vld [vmem:[%s1562_s13 + $0x68] sm:$0xff]  ;;  %v327_v39 = vpack.c.bf16 %v308_v32, %v307_v31 }
  0x16   : > { %1348 = vmatmul.mubr.msk.bf16.vlgmr.msra.gmra.mxu1 %vm354_vm0, %v324_v22  ;;  %v320_v40 = vpack.c.bf16 %v294_v34, %v293_v33  ;;  %v321_v41 = vpack.c.bf16 %v296_v36, %v295_v35  ;;  %v309_v42 = vld [vmem:[%s1562_s13 + $0xd0] sm:$0xff]  ;;  %v310_v43 = vld [vmem:[%s1562_s13 + $0xd8] sm:$0xff]  ;;  %v311_v44 = vld [vmem:[%s1562_s13 + $0xe0] sm:$0xff] }
  0x17   : > { %1351 = vmatprep.mubr.msk.bf16.mxu1 %vm354_vm0, %v325_v26  ;;  %1364 = vmatpush3.bf16.msra.mxu1 %v1473_v2  ;;  %v312_v45 = vld [vmem:[%s1562_s13 + $0xe8] sm:$0xff]  ;;  %v297_v47 = vld [vmem:[%s1562_s13 + $0x70] sm:$0xff]  ;;  %v298_v48 = vld [vmem:[%s1562_s13 + $0x78] sm:$0xff]  ;;  %v328_v49 = vpack.c.bf16 %v310_v43, %v309_v42 }
  0x18   : > { %1365 = vmatprep.subr.bf16.mxu1 %v1474_v24  ;;  %v329_v50 = vpack.c.bf16 %v312_v45, %v311_v44  ;;  %v322_v51 = vpack.c.bf16 %v298_v48, %v297_v47  ;;  %v313_v52 = vld [vmem:[%s1562_s13 + $0xf0] sm:$0xff]  ;;  %v314_v53 = vld [vmem:[%s1562_s13 + $0xf8] sm:$0xff]  ;;  %v1480_v57 = vld [vmem:[%s1860_s3] sm:$0xff]  }
  0x19   : > { %v330_v54 = vpack.c.bf16 %v314_v53, %v313_v52  ;;  %v1481_v58 = vld [vmem:[%s1862_s5 + $0x38] sm:$0xff]   ;;  %v1482_v59 = vld [vmem:[%s1862_s5 + $0x30] sm:$0xff]   ;;  %v1483_v60 = vld [vmem:[%s1862_s5 + $0x28] sm:$0xff]  }
  0x1a   : > { %1411 = vmatprep.subr.bf16.mxu0 %v1481_v58  ;;  %v1484_v61 = vld [vmem:[%s1862_s5 + $0x20] sm:$0xff]   ;;  %v1485_v62 = vld [vmem:[%s1862_s5 + $0x18] sm:$0xff]  }
  0x1b   : > { %1366 = vmatpush3.bf16.msra.mxu1 %v1474_v24  ;;  %1412 = vmatpush3.bf16.msra.mxu0 %v1481_v58  ;;  %v1651_v1 = vld [vmem:[%s1859_s2] ss:$0 sm:$0xff] }
  0x1c   : > { %1336 = vmatmul.mubr.msk.bf16.gmra.mxu0 %vm354_vm0, %v318_v25  ;;  %1367 = vmatprep.subr.bf16.mxu1 %v1475_v30 }
  0x1d   : > { %1339 = vmatprep.mubr.msk.bf16.mxu0 %vm354_vm0, %v319_v27  ;;  %1413 = vmatprep.subr.bf16.mxu0 %v1482_v59 }
  0x1e   : > { %1352 = vmatmul.mubr.msk.bf16.gmra.mxu1 %vm354_vm0, %v326_v37 }
  0x1f   : > { %1355 = vmatprep.mubr.msk.bf16.mxu1 %vm354_vm0, %v327_v39  ;;  %1368 = vmatpush3.bf16.msra.mxu1 %v1475_v30 }
  0x20   : > { %1369 = vmatprep.subr.bf16.mxu1 %v1476_v38  ;;  %1414 = vmatpush3.bf16.msra.mxu0 %v1482_v59 }
  0x21   : > { %1415 = vmatprep.subr.bf16.mxu0 %v1483_v60 }
  0x23   : > { %1370 = vmatpush3.bf16.msra.mxu1 %v1476_v38 }
  0x24   : > { %1340 = vmatmul.mubr.msk.bf16.gmra.mxu0 %vm354_vm0, %v320_v40  ;;  %1371 = vmatprep.subr.bf16.mxu1 %v1477_v46 }
  0x25   : > { %1343 = vmatprep.mubr.msk.bf16.mxu0 %vm354_vm0, %v321_v41  ;;  %1416 = vmatpush3.bf16.msra.mxu0 %v1483_v60 }
  0x26   : > { %1356 = vmatmul.mubr.msk.bf16.gmra.mxu1 %vm354_vm0, %v328_v49  ;;  %1417 = vmatprep.subr.bf16.mxu0 %v1484_v61 }
  0x27   : > { %1359 = vmatprep.mubr.msk.bf16.mxu1 %vm354_vm0, %v329_v50  ;;  %1372 = vmatpush3.bf16.msra.mxu1 %v1477_v46 }
  0x28   : > { %1373 = vmatprep.subr.bf16.mxu1 %v1478_v55 }
  0x29   : > { %1418 = vmatpush3.bf16.msra.mxu0 %v1484_v61 }
  0x2a   : > { %1419 = vmatprep.subr.bf16.mxu0 %v1485_v62 }
  0x2b   : > { %1374 = vmatpush3.bf16.msra.mxu1 %v1478_v55 }
  0x2c   : > { %1344 = vmatmul.mubr.msk.bf16.gmra.mxu0 %vm354_vm0, %v322_v51  ;;  %1375 = vmatprep.subr.bf16.mxu1 %v1479_v56 }
  0x2d   : > { %1420 = vmatpush3.bf16.msra.mxu0 %v1485_v62 }
  0x2e   : > { %1360 = vmatmul.mubr.msk.bf16.gmra.mxu1 %vm354_vm0, %v330_v54 }
  0x2f   : > { %1376 = vmatpush3.bf16.msra.mxu1 %v1479_v56 }
  0x30   : > { %1377 = vmatprep.subr.bf16.mxu1 %v1480_v57 }
  0x33   : > { %1378 = vmatpush3.bf16.msra.mxu1 %v1480_v57 }
  0xd4   : > { %v1333_v63 = vpop.f32.mrf.mxu0 }
  0xd5   : > { %v446_v6 = vadd.f32 %v1333_v63, %v1651_v1 }
  0xd6   : > { %v437_v0 = vpop.f32.mrf.mxu0  ;;  %v1655_v5 = vpop.f32.mrf.mxu1 }
  0xd7   : > { %v438_v3 = vadd.f32 %v1651_v1, %v437_v0  ;;  %v566_v15 = vmax.f32 %v446_v6, 0.0 }
  0xd8   : > { %v1334_v2 = vpop.f32.mrf.mxu0  ;;  %v501_v9 = vpop.f32.mrf.mxu1 }
  0xd9   : > { %v449_v4 = vadd.f32 %v1334_v2, %v1651_v1  ;;  %v564_v12 = vmax.f32 %v438_v3, 0.0  ;;  %v502_v53 = vadd.f32 %v1651_v1, %v501_v9 }
  0xda   : > { %v440_v7 = vpop.f32.mrf.mxu0  ;;  %v1659_v14 = vpop.f32.mrf.mxu1 }
  0xdb   : > { %v441_v8 = vadd.f32 %v1651_v1, %v440_v7  ;;  %v567_v10 = vmax.f32 %v449_v4, 0.0  ;;  %v580_v62 = vmax.f32 %v502_v53, 0.0  ;;  %v1712_v53 = vld [vmem:[%s1861_s4] ss:$0 sm:$0xff] }
  0xdc   : > { %v1337_v11 = vpop.f32.mrf.mxu0  ;;  %v504_v18 = vpop.f32.mrf.mxu1 }
  0xdd   : > { %v565_v13 = vmax.f32 %v441_v8, 0.0  ;;  %v597_v19 = vpack.c.bf16 %v567_v10, %v566_v15  ;;  %v462_v24 = vadd.f32 %v1337_v11, %v1651_v1  ;;  %v505_v54 = vadd.f32 %v1651_v1, %v504_v18 }
  0xde   : > { %v453_v16 = vpop.f32.mrf.mxu0  ;;  %v1663_v23 = vpop.f32.mrf.mxu1  ;;  %v513_v15 = vadd.f32 %v1659_v14, %v1651_v1 }
  0xdf   : > { %v596_v17 = vpack.c.bf16 %v565_v13, %v564_v12  ;;  %v454_v21 = vadd.f32 %v1651_v1, %v453_v16  ;;  %v570_v33 = vmax.f32 %v462_v24, 0.0  ;;  %v581_v0 = vmax.f32 %v505_v54, 0.0 }
  0xe0   : > { %v1338_v20 = vpop.f32.mrf.mxu0  ;;  %v517_v27 = vpop.f32.mrf.mxu1  ;;  %v510_v12 = vadd.f32 %v1655_v5, %v1651_v1  ;;  %v526_v5 = vadd.f32 %v1663_v23, %v1651_v1 }
  0xe1   : > { %v465_v22 = vadd.f32 %v1338_v20, %v1651_v1  ;;  %1379 = vmatprep.mubr.bf16.mxu1 %v596_v17  ;;  %v568_v30 = vmax.f32 %v454_v21, 0.0  ;;  %v604_v9 = vpack.c.bf16 %v581_v0, %v580_v62  ;;  %v518_v10 = vadd.f32 %v1651_v1, %v517_v27 }
  0xe2   : > { %v456_v25 = vpop.f32.mrf.mxu0  ;;  %1380 = vmatmul.mubr.bf16.vlgmr.msra.gmra.mxu1 %v597_v19  ;;  %v1667_v32 = vpop.f32.mrf.mxu1  ;;  %v582_v19 = vmax.f32 %v510_v12, 0.0  ;;  %v583_v20 = vmax.f32 %v513_v15, 0.0 }
  0xe3   : > { %v457_v26 = vadd.f32 %v1651_v1, %v456_v25  ;;  %v571_v28 = vmax.f32 %v465_v22, 0.0  ;;  %v584_v17 = vmax.f32 %v518_v10, 0.0  ;;  %v529_v14 = vadd.f32 %v1667_v32, %v1651_v1 }
  0xe4   : > { %v1341_v29 = vpop.f32.mrf.mxu0  ;;  %v520_v36 = vpop.f32.mrf.mxu1 }
  0xe5   : > { %v569_v31 = vmax.f32 %v457_v26, 0.0  ;;  %v599_v37 = vpack.c.bf16 %v571_v28, %v570_v33  ;;  %v478_v42 = vadd.f32 %v1341_v29, %v1651_v1  ;;  %v521_v11 = vadd.f32 %v1651_v1, %v520_v36 }
  0xe6   : > { %v469_v34 = vpop.f32.mrf.mxu0  ;;  %v1671_v41 = vpop.f32.mrf.mxu1  ;;  %v605_v26 = vpack.c.bf16 %v583_v20, %v582_v19 }
  0xe7   : > { %v598_v35 = vpack.c.bf16 %v569_v31, %v568_v30  ;;  %v470_v39 = vadd.f32 %v1651_v1, %v469_v34  ;;  %v574_v50 = vmax.f32 %v478_v42, 0.0  ;;  %v585_v18 = vmax.f32 %v521_v11, 0.0 }
  0xe8   : > { %v1342_v38 = vpop.f32.mrf.mxu0  ;;  %v533_v47 = vpop.f32.mrf.mxu1  ;;  %v586_v30 = vmax.f32 %v526_v5, 0.0  ;;  %v587_v31 = vmax.f32 %v529_v14, 0.0  ;;  %v542_v23 = vadd.f32 %v1671_v41, %v1651_v1  ;;  %v1486_v41 = vld [vmem:[%s1862_s5 + $0x10] sm:$0xff]  }
  0xe9   : > { %v481_v40 = vadd.f32 %v1342_v38, %v1651_v1  ;;  %1383 = vmatprep.mubr.bf16.mxu1 %v598_v35  ;;  %v572_v48 = vmax.f32 %v470_v39, 0.0  ;;  %v606_v22 = vpack.c.bf16 %v585_v18, %v584_v17  ;;  %v534_v24 = vadd.f32 %v1651_v1, %v533_v47  ;;  %1421 = vmatprep.subr.bf16.mxu0 %v1486_v41 }
  0xea   : > { %v472_v43 = vpop.f32.mrf.mxu0  ;;  %1384 = vmatmul.mubr.bf16.gmra.mxu1 %v599_v37  ;;  %v1358_v57 = vpop.f32.mrf.mxu1  ;;  %v607_v37 = vpack.c.bf16 %v587_v31, %v586_v30  ;;  %1422 = vmatpush3.bf16.msra.mxu0 %v1486_v41 }
  0xeb   : > { %v473_v44 = vadd.f32 %v1651_v1, %v472_v43  ;;  %v575_v45 = vmax.f32 %v481_v40, 0.0  ;;  %v588_v28 = vmax.f32 %v534_v24, 0.0  ;;  %v545_v38 = vadd.f32 %v1358_v57, %v1651_v1 }
  0xec   : > { %v1345_v46 = vpop.f32.mrf.mxu0  ;;  %v536_v3 = vpop.f32.mrf.mxu1  ;;  %v590_v40 = vmax.f32 %v542_v23, 0.0 }
  0xed   : > { %v573_v49 = vmax.f32 %v473_v44, 0.0  ;;  %v601_v55 = vpack.c.bf16 %v575_v45, %v574_v50  ;;  %v494_v60 = vadd.f32 %v1345_v46, %v1651_v1  ;;  %v537_v25 = vadd.f32 %v1651_v1, %v536_v3  ;;  %v1487_v50 = vld [vmem:[%s1862_s5 + $0x8] sm:$0xff]  }
  0xee   : > { %v485_v51 = vpop.f32.mrf.mxu0  ;;  %v1361_v16 = vpop.f32.mrf.mxu1  ;;  %v591_v42 = vmax.f32 %v545_v38, 0.0  ;;  %1423 = vmatprep.subr.bf16.mxu0 %v1487_v50 }
  0xef   : > { %v600_v52 = vpack.c.bf16 %v573_v49, %v572_v48  ;;  %v486_v58 = vadd.f32 %v1651_v1, %v485_v51  ;;  %v578_v7 = vmax.f32 %v494_v60, 0.0  ;;  %v589_v29 = vmax.f32 %v537_v25, 0.0  ;;  %1424 = vmatpush3.bf16.msra.mxu0 %v1487_v50 }
  0xf0   : > { %v1346_v56 = vpop.f32.mrf.mxu0  ;;  %v549_v21 = vpop.f32.mrf.mxu1  ;;  %v609_v44 = vpack.c.bf16 %v591_v42, %v590_v40  ;;  %v558_v45 = vadd.f32 %v1361_v16, %v1651_v1 }
  0xf1   : > { %v497_v59 = vadd.f32 %v1346_v56, %v1651_v1  ;;  %1387 = vmatprep.mubr.bf16.mxu1 %v600_v52  ;;  %v576_v4 = vmax.f32 %v486_v58, 0.0  ;;  %v608_v34 = vpack.c.bf16 %v589_v29, %v588_v28  ;;  %v550_v35 = vadd.f32 %v1651_v1, %v549_v21 }
  0xf2   : > { %v488_v61 = vpop.f32.mrf.mxu0  ;;  %1388 = vmatmul.mubr.bf16.gmra.mxu1 %v601_v55  ;;  %v1362_v27 = vpop.f32.mrf.mxu1  ;;  %v594_v47 = vmax.f32 %v558_v45, 0.0 }
  0xf3   : > { %v489_v63 = vadd.f32 %v1651_v1, %v488_v61  ;;  %v579_v2 = vmax.f32 %v497_v59, 0.0  ;;  %v592_v32 = vmax.f32 %v550_v35, 0.0  ;;  %v561_v46 = vadd.f32 %v1362_v27, %v1651_v1 }
  0xf4   : > { %v552_v33 = vpop.f32.mrf.mxu1 }
  0xf5   : > { %v577_v6 = vmax.f32 %v489_v63, 0.0  ;;  %v603_v13 = vpack.c.bf16 %v579_v2, %v578_v7  ;;  %v553_v36 = vadd.f32 %v1651_v1, %v552_v33  ;;  %v595_v48 = vmax.f32 %v561_v46, 0.0  ;;  %v1488_v1 = vld [vmem:[%s1862_s5] sm:$0xff]  }
  0xf6   : > { %1425 = vmatprep.subr.bf16.mxu0 %v1488_v1 }
  0xf7   : > { %v602_v8 = vpack.c.bf16 %v577_v6, %v576_v4  ;;  %v593_v39 = vmax.f32 %v553_v36, 0.0  ;;  %v611_v49 = vpack.c.bf16 %v595_v48, %v594_v47  ;;  %1426 = vmatpush3.bf16.msra.mxu0 %v1488_v1 }
  0xf9   : > { %1391 = vmatprep.mubr.bf16.mxu1 %v602_v8  ;;  %v610_v43 = vpack.c.bf16 %v593_v39, %v592_v32 }
  0xfa   : > { %1392 = vmatmul.mubr.bf16.gmra.mxu1 %v603_v13 }
  0xfb   : > { %1395 = vmatprep.mubr.bf16.mxu1 %v604_v9 }
 0x102   : > { %1396 = vmatmul.mubr.bf16.gmra.mxu1 %v605_v26 }
 0x103   : > { %1399 = vmatprep.mubr.bf16.mxu1 %v606_v22 }
 0x10a   : > { %1400 = vmatmul.mubr.bf16.gmra.mxu1 %v607_v37 }
 0x10b   : > { %1403 = vmatprep.mubr.bf16.mxu1 %v608_v34 }
 0x112   : > { %1404 = vmatmul.mubr.bf16.gmra.mxu1 %v609_v44 }
 0x113   : > { %1407 = vmatprep.mubr.bf16.mxu1 %v610_v43 }
 0x11a   : > { %1408 = vmatmul.mubr.bf16.gmra.mxu1 %v611_v49 }
 0x1a2   : > { %v1381_v51 = vpop.f32.mrf.mxu1 }
 0x1a3   : > { %v726_v57 = vadd.f32 %v1381_v51, %v1712_v53 }
 0x1a4   : > { %v717_v52 = vpop.f32.mrf.mxu1 }
 0x1a5   : > { %v718_v55 = vadd.f32 %v1712_v53, %v717_v52  ;;  %v846_v0 = vmax.f32 %v726_v57, 0.0 }
 0x1a6   : > { %v1382_v54 = vpop.f32.mrf.mxu1 }
 0x1a7   : > { %v729_v56 = vadd.f32 %v1382_v54, %v1712_v53  ;;  %v844_v62 = vmax.f32 %v718_v55, 0.0 }
 0x1a8   : > { %v720_v58 = vpop.f32.mrf.mxu1 }
 0x1a9   : > { %v721_v59 = vadd.f32 %v1712_v53, %v720_v58  ;;  %v847_v60 = vmax.f32 %v729_v56, 0.0 }
 0x1aa   : > { %v1385_v61 = vpop.f32.mrf.mxu1 }
 0x1ab   : > { %v845_v63 = vmax.f32 %v721_v59, 0.0  ;;  %v877_v4 = vpack.c.bf16 %v847_v60, %v846_v0  ;;  %v742_v9 = vadd.f32 %v1385_v61, %v1712_v53 }
 0x1ac   : > { %v733_v2 = vpop.f32.mrf.mxu1 }
 0x1ad   : > { %v876_v3 = vpack.c.bf16 %v845_v63, %v844_v62  ;;  %v734_v7 = vadd.f32 %v1712_v53, %v733_v2  ;;  %v850_v17 = vmax.f32 %v742_v9, 0.0 }
 0x1ae   : > { %v1386_v6 = vpop.f32.mrf.mxu1 }
 0x1af   : > { %v745_v8 = vadd.f32 %v1386_v6, %v1712_v53  ;;  %1427 = vmatprep.mubr.bf16.mxu0 %v876_v3  ;;  %v848_v15 = vmax.f32 %v734_v7, 0.0 }
 0x1b0   : > { %v736_v10 = vpop.f32.mrf.mxu1  ;;  %1428 = vmatmul.mubr.bf16.vlgmr.msra.gmra.mxu0 %v877_v4 }
 0x1b1   : > { %v737_v11 = vadd.f32 %v1712_v53, %v736_v10  ;;  %v851_v12 = vmax.f32 %v745_v8, 0.0 }
 0x1b2   : > { %v1389_v13 = vpop.f32.mrf.mxu1 }
 0x1b3   : > { %v849_v16 = vmax.f32 %v737_v11, 0.0  ;;  %v879_v20 = vpack.c.bf16 %v851_v12, %v850_v17  ;;  %v758_v25 = vadd.f32 %v1389_v13, %v1712_v53 }
 0x1b4   : > { %v749_v18 = vpop.f32.mrf.mxu1 }
 0x1b5   : > { %v878_v19 = vpack.c.bf16 %v849_v16, %v848_v15  ;;  %v750_v22 = vadd.f32 %v1712_v53, %v749_v18  ;;  %v854_v30 = vmax.f32 %v758_v25, 0.0 }
 0x1b6   : > { %v1390_v21 = vpop.f32.mrf.mxu1 }
 0x1b7   : > { %v761_v24 = vadd.f32 %v1390_v21, %v1712_v53  ;;  %1431 = vmatprep.mubr.bf16.mxu0 %v878_v19  ;;  %v852_v28 = vmax.f32 %v750_v22, 0.0 }
 0x1b8   : > { %v752_v26 = vpop.f32.mrf.mxu1  ;;  %1432 = vmatmul.mubr.bf16.gmra.mxu0 %v879_v20 }
 0x1b9   : > { %v753_v5 = vadd.f32 %v1712_v53, %v752_v26  ;;  %v855_v14 = vmax.f32 %v761_v24, 0.0 }
 0x1ba   : > { %v1393_v27 = vpop.f32.mrf.mxu1 }
 0x1bb   : > { %v853_v29 = vmax.f32 %v753_v5, 0.0  ;;  %v881_v34 = vpack.c.bf16 %v855_v14, %v854_v30  ;;  %v774_v23 = vadd.f32 %v1393_v27, %v1712_v53 }
 0x1bc   : > { %v765_v31 = vpop.f32.mrf.mxu1 }
 0x1bd   : > { %v880_v33 = vpack.c.bf16 %v853_v29, %v852_v28  ;;  %v766_v36 = vadd.f32 %v1712_v53, %v765_v31  ;;  %v858_v44 = vmax.f32 %v774_v23, 0.0 }
 0x1be   : > { %v1394_v35 = vpop.f32.mrf.mxu1 }
 0x1bf   : > { %v777_v37 = vadd.f32 %v1394_v35, %v1712_v53  ;;  %1435 = vmatprep.mubr.bf16.mxu0 %v880_v33  ;;  %v856_v42 = vmax.f32 %v766_v36, 0.0 }
 0x1c0   : > { %v768_v38 = vpop.f32.mrf.mxu1  ;;  %1436 = vmatmul.mubr.bf16.gmra.mxu0 %v881_v34 }
 0x1c1   : > { %v769_v32 = vadd.f32 %v1712_v53, %v768_v38  ;;  %v859_v39 = vmax.f32 %v777_v37, 0.0 }
 0x1c2   : > { %v1397_v40 = vpop.f32.mrf.mxu1 }
 0x1c3   : > { %v857_v43 = vmax.f32 %v769_v32, 0.0  ;;  %v883_v47 = vpack.c.bf16 %v859_v39, %v858_v44  ;;  %v790_v50 = vadd.f32 %v1397_v40, %v1712_v53  ;;  %v1749_v32 = vld [vmem:[%s1863_s6] ss:$0 sm:$0xff] }
 0x1c4   : > { %v781_v45 = vpop.f32.mrf.mxu1 }
 0x1c5   : > { %v882_v46 = vpack.c.bf16 %v857_v43, %v856_v42  ;;  %v782_v49 = vadd.f32 %v1712_v53, %v781_v45  ;;  %v862_v57 = vmax.f32 %v790_v50, 0.0 }
 0x1c6   : > { %v1398_v48 = vpop.f32.mrf.mxu1 }
 0x1c7   : > { %v793_v41 = vadd.f32 %v1398_v48, %v1712_v53  ;;  %1439 = vmatprep.mubr.bf16.mxu0 %v882_v46  ;;  %v860_v55 = vmax.f32 %v782_v49, 0.0 }
 0x1c8   : > { %v784_v1 = vpop.f32.mrf.mxu1  ;;  %1440 = vmatmul.mubr.bf16.gmra.mxu0 %v883_v47 }
 0x1c9   : > { %v785_v51 = vadd.f32 %v1712_v53, %v784_v1  ;;  %v863_v52 = vmax.f32 %v793_v41, 0.0 }
 0x1ca   : > { %v1401_v54 = vpop.f32.mrf.mxu1 }
 0x1cb   : > { %v861_v56 = vmax.f32 %v785_v51, 0.0  ;;  %v885_v60 = vpack.c.bf16 %v863_v52, %v862_v57  ;;  %v806_v0 = vadd.f32 %v1401_v54, %v1712_v53 }
 0x1cc   : > { %v797_v58 = vpop.f32.mrf.mxu1 }
 0x1cd   : > { %v884_v59 = vpack.c.bf16 %v861_v56, %v860_v55  ;;  %v798_v62 = vadd.f32 %v1712_v53, %v797_v58  ;;  %v866_v9 = vmax.f32 %v806_v0, 0.0 }
 0x1ce   : > { %v1402_v61 = vpop.f32.mrf.mxu1 }
 0x1cf   : > { %v809_v63 = vadd.f32 %v1402_v61, %v1712_v53  ;;  %1443 = vmatprep.mubr.bf16.mxu0 %v884_v59  ;;  %v864_v7 = vmax.f32 %v798_v62, 0.0 }
 0x1d0   : > { %v800_v2 = vpop.f32.mrf.mxu1  ;;  %1444 = vmatmul.mubr.bf16.gmra.mxu0 %v885_v60 }
 0x1d1   : > { %v801_v3 = vadd.f32 %v1712_v53, %v800_v2  ;;  %v867_v4 = vmax.f32 %v809_v63, 0.0 }
 0x1d2   : > { %v1405_v6 = vpop.f32.mrf.mxu1 }
 0x1d3   : > { %v865_v8 = vmax.f32 %v801_v3, 0.0  ;;  %v887_v12 = vpack.c.bf16 %v867_v4, %v866_v9  ;;  %v822_v17 = vadd.f32 %v1405_v6, %v1712_v53 }
 0x1d4   : > { %v813_v10 = vpop.f32.mrf.mxu1 }
 0x1d5   : > { %v886_v11 = vpack.c.bf16 %v865_v8, %v864_v7  ;;  %v814_v15 = vadd.f32 %v1712_v53, %v813_v10  ;;  %v870_v25 = vmax.f32 %v822_v17, 0.0 }
 0x1d6   : > { %v1406_v13 = vpop.f32.mrf.mxu1 }
 0x1d7   : > { %v825_v16 = vadd.f32 %v1406_v13, %v1712_v53  ;;  %1447 = vmatprep.mubr.bf16.mxu0 %v886_v11  ;;  %v868_v22 = vmax.f32 %v814_v15, 0.0 }
 0x1d8   : > { %v816_v18 = vpop.f32.mrf.mxu1  ;;  %1448 = vmatmul.mubr.bf16.gmra.mxu0 %v887_v12 }
 0x1d9   : > { %v817_v19 = vadd.f32 %v1712_v53, %v816_v18  ;;  %v871_v20 = vmax.f32 %v825_v16, 0.0 }
 0x1da   : > { %v1409_v21 = vpop.f32.mrf.mxu1 }
 0x1db   : > { %v869_v24 = vmax.f32 %v817_v19, 0.0  ;;  %v889_v14 = vpack.c.bf16 %v871_v20, %v870_v25  ;;  %v838_v30 = vadd.f32 %v1409_v21, %v1712_v53 }
 0x1dc   : > { %v829_v26 = vpop.f32.mrf.mxu1 }
 0x1dd   : > { %v888_v5 = vpack.c.bf16 %v869_v24, %v868_v22  ;;  %v830_v28 = vadd.f32 %v1712_v53, %v829_v26  ;;  %v874_v37 = vmax.f32 %v838_v30, 0.0 }
 0x1de   : > { %v1410_v27 = vpop.f32.mrf.mxu1 }
 0x1df   : > { %v841_v29 = vadd.f32 %v1410_v27, %v1712_v53  ;;  %1451 = vmatprep.mubr.bf16.mxu0 %v888_v5  ;;  %v872_v35 = vmax.f32 %v830_v28, 0.0 }
 0x1e0   : > { %v832_v31 = vpop.f32.mrf.mxu1  ;;  %1452 = vmatmul.mubr.bf16.gmra.mxu0 %v889_v14 }
 0x1e1   : > { %v833_v33 = vadd.f32 %v1712_v53, %v832_v31  ;;  %v875_v34 = vmax.f32 %v841_v29, 0.0 }
 0x1e3   : > { %v873_v36 = vmax.f32 %v833_v33, 0.0  ;;  %v891_v38 = vpack.c.bf16 %v875_v34, %v874_v37 }
 0x1e5   : > { %v890_v23 = vpack.c.bf16 %v873_v36, %v872_v35 }
 0x1e7   : > { %1455 = vmatprep.mubr.bf16.mxu0 %v890_v23 }
 0x1e8   : > { %1456 = vmatmul.mubr.bf16.gmra.mxu0 %v891_v38 }
 0x270   : > { %v1429_v53 = vpop.f32.mrf.mxu0 }
 0x271   : > { %v1006_v39 = vadd.f32 %v1429_v53, %v1749_v32 }
 0x272   : > { %v997_v40 = vpop.f32.mrf.mxu0 }
 0x273   : > { %1127 = vst.msk [vmem:[%s1756_s12 + $0x10] sm:$0xff] %vm1124_vm1, %v1006_v39  ;;  %v998_v42 = vadd.f32 %v1749_v32, %v997_v40 }
 0x274   : > { %v1430_v43 = vpop.f32.mrf.mxu0 }
 0x275   : > { %1125 = vst.msk [vmem:[%s1756_s12] sm:$0xff] %vm1124_vm1, %v998_v42  ;;  %v1009_v44 = vadd.f32 %v1430_v43, %v1749_v32 }
 0x276   : > { %v1000_v45 = vpop.f32.mrf.mxu0 }
 0x277   : > { %1128 = vst.msk [vmem:[%s1756_s12 + $0x18] sm:$0xff] %vm1124_vm1, %v1009_v44  ;;  %v1001_v46 = vadd.f32 %v1749_v32, %v1000_v45 }
 0x278   : > { %v1433_v47 = vpop.f32.mrf.mxu0 }
 0x279   : > { %1126 = vst.msk [vmem:[%s1756_s12 + $0x8] sm:$0xff] %vm1124_vm1, %v1001_v46  ;;  %v1022_v48 = vadd.f32 %v1433_v47, %v1749_v32 }
 0x27a   : > { %v1013_v49 = vpop.f32.mrf.mxu0 }
 0x27b   : > { %1131 = vst.msk [vmem:[%s1756_s12 + $0x30] sm:$0xff] %vm1124_vm1, %v1022_v48  ;;  %v1014_v41 = vadd.f32 %v1749_v32, %v1013_v49 }
 0x27c   : > { %v1434_v50 = vpop.f32.mrf.mxu0 }
 0x27d   : > { %1129 = vst.msk [vmem:[%s1756_s12 + $0x20] sm:$0xff] %vm1124_vm1, %v1014_v41  ;;  %v1025_v1 = vadd.f32 %v1434_v50, %v1749_v32 }
 0x27e   : > { %v1016_v51 = vpop.f32.mrf.mxu0 }
 0x27f   : > { %1132 = vst.msk [vmem:[%s1756_s12 + $0x38] sm:$0xff] %vm1124_vm1, %v1025_v1  ;;  %v1017_v52 = vadd.f32 %v1749_v32, %v1016_v51 }
 0x280   : > { %v1437_v54 = vpop.f32.mrf.mxu0 }
 0x281   : > { %1130 = vst.msk [vmem:[%s1756_s12 + $0x28] sm:$0xff] %vm1124_vm1, %v1017_v52  ;;  %v1038_v55 = vadd.f32 %v1437_v54, %v1749_v32 }
 0x282   : > { %v1029_v56 = vpop.f32.mrf.mxu0 }
 0x283   : > { %1135 = vst.msk [vmem:[%s1756_s12 + $0x50] sm:$0xff] %vm1124_vm1, %v1038_v55  ;;  %v1030_v57 = vadd.f32 %v1749_v32, %v1029_v56 }
 0x284   : > { %v1438_v58 = vpop.f32.mrf.mxu0 }
 0x285   : > { %1133 = vst.msk [vmem:[%s1756_s12 + $0x40] sm:$0xff] %vm1124_vm1, %v1030_v57  ;;  %v1041_v59 = vadd.f32 %v1438_v58, %v1749_v32 }
 0x286   : > { %v1032_v60 = vpop.f32.mrf.mxu0 }
 0x287   : > { %1136 = vst.msk [vmem:[%s1756_s12 + $0x58] sm:$0xff] %vm1124_vm1, %v1041_v59  ;;  %v1033_v61 = vadd.f32 %v1749_v32, %v1032_v60 }
 0x288   : > { %v1441_v62 = vpop.f32.mrf.mxu0 }
 0x289   : > { %1134 = vst.msk [vmem:[%s1756_s12 + $0x48] sm:$0xff] %vm1124_vm1, %v1033_v61  ;;  %v1054_v63 = vadd.f32 %v1441_v62, %v1749_v32 }
 0x28a   : > { %v1045_v0 = vpop.f32.mrf.mxu0 }
 0x28b   : > { %1139 = vst.msk [vmem:[%s1756_s12 + $0x70] sm:$0xff] %vm1124_vm1, %v1054_v63  ;;  %v1046_v2 = vadd.f32 %v1749_v32, %v1045_v0 }
 0x28c   : > { %v1442_v3 = vpop.f32.mrf.mxu0 }
 0x28d   : > { %1137 = vst.msk [vmem:[%s1756_s12 + $0x60] sm:$0xff] %vm1124_vm1, %v1046_v2  ;;  %v1057_v4 = vadd.f32 %v1442_v3, %v1749_v32 }
 0x28e   : > { %v1048_v6 = vpop.f32.mrf.mxu0 }
 0x28f   : > { %1140 = vst.msk [vmem:[%s1756_s12 + $0x78] sm:$0xff] %vm1124_vm1, %v1057_v4  ;;  %v1049_v7 = vadd.f32 %v1749_v32, %v1048_v6 }
 0x290   : > { %v1445_v8 = vpop.f32.mrf.mxu0 }
 0x291   : > { %1138 = vst.msk [vmem:[%s1756_s12 + $0x68] sm:$0xff] %vm1124_vm1, %v1049_v7  ;;  %v1070_v9 = vadd.f32 %v1445_v8, %v1749_v32 }
 0x292   : > { %v1061_v10 = vpop.f32.mrf.mxu0 }
 0x293   : > { %1143 = vst.msk [vmem:[%s1756_s12 + $0x90] sm:$0xff] %vm1124_vm1, %v1070_v9  ;;  %v1062_v11 = vadd.f32 %v1749_v32, %v1061_v10 }
 0x294   : > { %v1446_v12 = vpop.f32.mrf.mxu0 }
 0x295   : > { %1141 = vst.msk [vmem:[%s1756_s12 + $0x80] sm:$0xff] %vm1124_vm1, %v1062_v11  ;;  %v1073_v13 = vadd.f32 %v1446_v12, %v1749_v32 }
 0x296   : > { %v1064_v15 = vpop.f32.mrf.mxu0 }
 0x297   : > { %1144 = vst.msk [vmem:[%s1756_s12 + $0x98] sm:$0xff] %vm1124_vm1, %v1073_v13  ;;  %v1065_v16 = vadd.f32 %v1749_v32, %v1064_v15 }
 0x298   : > { %v1449_v17 = vpop.f32.mrf.mxu0 }
 0x299   : > { %1142 = vst.msk [vmem:[%s1756_s12 + $0x88] sm:$0xff] %vm1124_vm1, %v1065_v16  ;;  %v1086_v18 = vadd.f32 %v1449_v17, %v1749_v32 }
 0x29a   : > { %v1077_v19 = vpop.f32.mrf.mxu0 }
 0x29b   : > { %1147 = vst.msk [vmem:[%s1756_s12 + $0xb0] sm:$0xff] %vm1124_vm1, %v1086_v18  ;;  %v1078_v20 = vadd.f32 %v1749_v32, %v1077_v19 }
 0x29c   : > { %v1450_v21 = vpop.f32.mrf.mxu0 }
 0x29d   : > { %1145 = vst.msk [vmem:[%s1756_s12 + $0xa0] sm:$0xff] %vm1124_vm1, %v1078_v20  ;;  %v1089_v22 = vadd.f32 %v1450_v21, %v1749_v32 }
 0x29e   : > { %v1080_v24 = vpop.f32.mrf.mxu0 }
 0x29f   : > { %1148 = vst.msk [vmem:[%s1756_s12 + $0xb8] sm:$0xff] %vm1124_vm1, %v1089_v22  ;;  %v1081_v25 = vadd.f32 %v1749_v32, %v1080_v24 }
 0x2a0   : > { %v1453_v26 = vpop.f32.mrf.mxu0 }
 0x2a1   : > { %1146 = vst.msk [vmem:[%s1756_s12 + $0xa8] sm:$0xff] %vm1124_vm1, %v1081_v25  ;;  %v1102_v5 = vadd.f32 %v1453_v26, %v1749_v32 }
 0x2a2   : > { %v1093_v14 = vpop.f32.mrf.mxu0 }
 0x2a3   : > { %1151 = vst.msk [vmem:[%s1756_s12 + $0xd0] sm:$0xff] %vm1124_vm1, %v1102_v5  ;;  %v1094_v27 = vadd.f32 %v1749_v32, %v1093_v14 }
 0x2a4   : > { %v1454_v28 = vpop.f32.mrf.mxu0 }
 0x2a5   : > { %1149 = vst.msk [vmem:[%s1756_s12 + $0xc0] sm:$0xff] %vm1124_vm1, %v1094_v27  ;;  %v1105_v29 = vadd.f32 %v1454_v28, %v1749_v32 }
 0x2a6   : > { %v1096_v30 = vpop.f32.mrf.mxu0 }
 0x2a7   : > { %1152 = vst.msk [vmem:[%s1756_s12 + $0xd8] sm:$0xff] %vm1124_vm1, %v1105_v29  ;;  %v1097_v31 = vadd.f32 %v1749_v32, %v1096_v30 }
 0x2a8   : > { %v1457_v33 = vpop.f32.mrf.mxu0 }
 0x2a9   : > { %1150 = vst.msk [vmem:[%s1756_s12 + $0xc8] sm:$0xff] %vm1124_vm1, %v1097_v31  ;;  %v1118_v34 = vadd.f32 %v1457_v33, %v1749_v32 }
 0x2aa   : > { %v1109_v35 = vpop.f32.mrf.mxu0 }
 0x2ab   : > { %1155 = vst.msk [vmem:[%s1756_s12 + $0xf0] sm:$0xff] %vm1124_vm1, %v1118_v34  ;;  %v1110_v36 = vadd.f32 %v1749_v32, %v1109_v35 }
 0x2ac   : > { %v1458_v37 = vpop.f32.mrf.mxu0 }
 0x2ad   : > { %1153 = vst.msk [vmem:[%s1756_s12 + $0xe0] sm:$0xff] %vm1124_vm1, %v1110_v36  ;;  %v1121_v23 = vadd.f32 %v1458_v37, %v1749_v32 }
 0x2ae   : > { %v1112_v38 = vpop.f32.mrf.mxu0 }
 0x2af   : > { %1156 = vst.msk [vmem:[%s1756_s12 + $0xf8] sm:$0xff] %vm1124_vm1, %v1121_v23  ;;  %v1113_v53 = vadd.f32 %v1749_v32, %v1112_v38 }
 0x2b1   : > { %1154 = vst.msk [vmem:[%s1756_s12 + $0xe8] sm:$0xff] %vm1124_vm1, %v1113_v53 }
 0x2b2 PF: > { %s17_s24 = sadd.s32 1, %s1495_s24  }
 0x2b3   : > { %p14_p4 = scmp.ge.s32.totalorder %s17_s24, 4  }
 0x2b5   :  { %16 = sbr.rel (!%p14_p4) target bundleno = 1 (0x1), region = 78 }

</bundles_post_ra>
